<compile_context>
chip_gen: v7x
topology: tpu7x:2x2x1
jax: 0.10.0
libtpu: 0.0.40
codegen_flags: <defaults>
</compile_context>

<pallas_src>
import functools

import jax
import jax.numpy as jnp
from jax import lax
from jax.experimental import pallas as pl
from jax.experimental.pallas import tpu as pltpu

_LANE = 128
_MAX_BLOCK_ROWS = 2048            # (2048, 128) f32 tile = 1 MiB per buffer

# ----------------------- portable counter-based PRNG -----------------------
_GOLDEN = 0x9E3779B9              # Weyl-sequence multiplier (odd)
_MIX1 = 0x7FEB352D                # lowbias32 multipliers (Chris Wellons)
_MIX2 = 0x846CA68B
_SEED_MULT = 374761393            # odd, fits in int32


def _u32(v):
    return jnp.uint32(v)


def _hash_u32(x):
    """lowbias32: high-avalanche 32-bit mix of a counter (uint32 -> uint32)."""
    x = x ^ (x >> _u32(16))
    x = x * _u32(_MIX1)
    x = x ^ (x >> _u32(15))
    x = x * _u32(_MIX2)
    x = x ^ (x >> _u32(16))
    return x


def _uniform_open01(bits):
    """uint32 bits -> f32 uniform strictly inside (0, 1) (23 random bits)."""
    m = (bits >> _u32(9)).astype(jnp.int32)          # [0, 2^23), exact in f32
    return (m.astype(jnp.float32) + 0.5) * (1.0 / (1 << 23))


# ------------- Acklam's inverse normal CDF (probit), branchless -------------
_A = (-3.969683028665376e+01, 2.209460984245205e+02, -2.759285104469687e+02,
      1.383577518672690e+02, -3.066479806614716e+01, 2.506628277459239e+00)
_B = (-5.447609879822406e+01, 1.615858368580409e+02, -1.556989798598866e+02,
      6.680131188771972e+01, -1.328068155288572e+01)
_C = (-7.784894002430293e-03, -3.223964580411365e-01, -2.400758277161838e+00,
      -2.549732539343734e+00, 4.374664141464968e+00, 2.938163982698783e+00)
_D = (7.784695709041462e-03, 3.224671290700398e-01, 2.445134137142996e+00,
      3.754408661907416e+00)
_P_LOW = 0.02425


def _polyval(coeffs, x):
    acc = coeffs[0] * x + coeffs[1]
    for c in coeffs[2:]:
        acc = acc * x + c
    return acc


def _probit(p):
    """z = Phi^{-1}(p).  Only log / sqrt / div / where (all Mosaic-lowerable).

    p is strictly inside (0, 1), so every branch stays finite (no NaN/Inf in
    the unselected lanes of the `where`s)."""
    # Central region (|z| <= ~1.97, ~95% of the mass).
    q = p - 0.5
    r = q * q
    z_cen = (_polyval(_A, r) * q) / (_polyval(_B, r) * r + 1.0)
    # Lower / upper tails.
    ql = jnp.sqrt(-2.0 * jnp.log(p))
    z_low = _polyval(_C, ql) / (_polyval(_D, ql) * ql + 1.0)
    qh = jnp.sqrt(-2.0 * jnp.log(1.0 - p))
    z_high = -_polyval(_C, qh) / (_polyval(_D, qh) * qh + 1.0)
    return jnp.where(p < _P_LOW, z_low,
                     jnp.where(p > 1.0 - _P_LOW, z_high, z_cen))


# ------------------------------ Pallas kernel ------------------------------
def _gaussian_noise_kernel(seed_ref, x_ref, o_ref, *, sigma, block_rows):
    shape = x_ref.shape                                   # (block_rows, 128)

    # Global element index of every lane in this tile -> PRNG counter.
    row = lax.broadcasted_iota(jnp.int32, shape, 0)
    lane = lax.broadcasted_iota(jnp.int32, shape, 1)
    base = pl.program_id(0) * (block_rows * _LANE)
    ctr = base + row * _LANE + lane
    # Fold the runtime seed in (int32 wrap-around is fine), then hash.
    ctr = ctr + seed_ref[0] * _SEED_MULT
    bits = _hash_u32(ctr.astype(jnp.uint32) * _u32(_GOLDEN) + _u32(1))

    z = _probit(_uniform_open01(bits))                    # z ~ N(0, 1)

    x = x_ref[...].astype(jnp.float32)
    o_ref[...] = (x * (1.0 + sigma * z)).astype(o_ref.dtype)


# -------------------------------- Wrapper ----------------------------------
def gaussian_noise(x, *, sigma=0.1, seed=0, training=True):
    """Pallas implementation of GaussianNoise.forward."""
    if (not training) or sigma == 0:
        return x                                          # identity, like torch

    orig_shape = x.shape
    dtype = x.dtype
    flat = x.reshape(-1)
    n = flat.shape[0]

    rows = -(-n // _LANE)                                 # ceil(n / 128)
    block_rows = min(_MAX_BLOCK_ROWS, ((rows + 7) // 8) * 8)   # 8-aligned
    grid_rows = -(-rows // block_rows)
    padded_rows = grid_rows * block_rows
    padded_n = padded_rows * _LANE
    if padded_n != n:
        flat = jnp.pad(flat, (0, padded_n - n))
    x2d = flat.reshape(padded_rows, _LANE)                # lane-dense view

    seed_arr = jnp.asarray([seed], dtype=jnp.int32)

    out2d = pl.pallas_call(
        functools.partial(_gaussian_noise_kernel, sigma=float(sigma),
                          block_rows=block_rows),
        out_shape=jax.ShapeDtypeStruct((padded_rows, _LANE), dtype),
        grid_spec=pltpu.PrefetchScalarGridSpec(
            num_scalar_prefetch=1,                        # seed -> SMEM
            grid=(grid_rows,),
            in_specs=[pl.BlockSpec((block_rows, _LANE), lambda i, seed: (i, 0))],
            out_specs=pl.BlockSpec((block_rows, _LANE), lambda i, seed: (i, 0)),
        ),
        compiler_params=pltpu.CompilerParams(
            dimension_semantics=("parallel",),            # tiles are independent
        ),
    )(seed_arr, x2d)

    return out2d.reshape(-1)[:n].reshape(orig_shape)


# ---------------------------------- main -----------------------------------
if __name__ == "__main__":
    key = jax.random.PRNGKey(0)
    x = jax.random.normal(key, (2, 4, 16, 16), jnp.float32)
    sigma = 0.1

    fwd = jax.jit(functools.partial(gaussian_noise, sigma=sigma, seed=0,
                                    training=True))
    y = fwd(x)
    jax.block_until_ready(y)

    assert y.shape == x.shape, y.shape
    assert bool(jnp.all(jnp.isfinite(y)))

    # Statistical sanity: (y - x) / x == sigma * z with z ~ N(0, 1).
    rel = (y - x) / jnp.where(jnp.abs(x) > 1e-6, x, 1.0)
    assert abs(float(jnp.mean(rel))) < 0.05, float(jnp.mean(rel))
    assert 0.03 < float(jnp.std(rel)) < 0.3, float(jnp.std(rel))

    # Eval mode (or sigma == 0) must be the identity, like the PyTorch module.
    y_eval = gaussian_noise(x, sigma=sigma, seed=0, training=False)
    assert bool(jnp.array_equal(y_eval, x))

    print("KERNEL_OK")
</pallas_src>

<mosaic_0001>
module attributes {stable_mosaic.version = 11 : i64} {
  func.func @_gaussian_noise_kernel(%arg0: i32, %arg1: memref<1xi32, #tpu.memory_space<smem>>, %arg2: memref<16x128xf32, #tpu.memory_space<vmem>>, %arg3: memref<16x128xf32, #tpu.memory_space<vmem>>) attributes {dimension_semantics = [#tpu.dimension_semantics<parallel>], iteration_bounds = array<i64: 1>, scalar_prefetch = 1 : i64, scratch_operands = 0 : i64, tpu.core_type = #tpu.core_type<tc>, window_params = [{transform_indices = @transform_0, window_bounds = array<i64: 16, 128>}, {transform_indices = @transform_1, window_bounds = array<i64: 16, 128>}]} {
    %0 = tpu.iota {dimensions = array<i32: 0>} : vector<16x128xi32>
    %1 = tpu.iota {dimensions = array<i32: 1>} : vector<16x128xi32>
    %c2048_i32 = arith.constant 2048 : i32
    %2 = arith.muli %arg0, %c2048_i32 : i32
    %c128_i32 = arith.constant 128 : i32
    %3 = vector.broadcast %c128_i32 : i32 to vector<16x128xi32>
    %4 = arith.muli %0, %3 : vector<16x128xi32>
    %5 = vector.broadcast %2 : i32 to vector<16x128xi32>
    %6 = arith.addi %5, %4 : vector<16x128xi32>
    %7 = arith.addi %6, %1 : vector<16x128xi32>
    %c0 = arith.constant 0 : index
    %8 = memref.load %arg1[%c0] : memref<1xi32, #tpu.memory_space<smem>>
    %c374761393_i32 = arith.constant 374761393 : i32
    %9 = arith.muli %8, %c374761393_i32 : i32
    %10 = vector.broadcast %9 : i32 to vector<16x128xi32>
    %11 = arith.addi %7, %10 : vector<16x128xi32>
    %c-1640531527_i32 = arith.constant -1640531527 : i32
    %12 = vector.broadcast %c-1640531527_i32 : i32 to vector<16x128xi32>
    %13 = arith.muli %11, %12 : vector<16x128xi32>
    %c1_i32 = arith.constant 1 : i32
    %14 = vector.broadcast %c1_i32 : i32 to vector<16x128xi32>
    %15 = arith.addi %13, %14 : vector<16x128xi32>
    %c16_i32 = arith.constant 16 : i32
    %16 = vector.broadcast %c16_i32 : i32 to vector<16x128xi32>
    %17 = arith.shrui %15, %16 : vector<16x128xi32>
    %18 = arith.xori %15, %17 : vector<16x128xi32>
    %c2146121005_i32 = arith.constant 2146121005 : i32
    %19 = vector.broadcast %c2146121005_i32 : i32 to vector<16x128xi32>
    %20 = arith.muli %18, %19 : vector<16x128xi32>
    %c15_i32 = arith.constant 15 : i32
    %21 = vector.broadcast %c15_i32 : i32 to vector<16x128xi32>
    %22 = arith.shrui %20, %21 : vector<16x128xi32>
    %23 = arith.xori %20, %22 : vector<16x128xi32>
    %c-2073254261_i32 = arith.constant -2073254261 : i32
    %24 = vector.broadcast %c-2073254261_i32 : i32 to vector<16x128xi32>
    %25 = arith.muli %23, %24 : vector<16x128xi32>
    %c16_i32_0 = arith.constant 16 : i32
    %26 = vector.broadcast %c16_i32_0 : i32 to vector<16x128xi32>
    %27 = arith.shrui %25, %26 : vector<16x128xi32>
    %28 = arith.xori %25, %27 : vector<16x128xi32>
    %c9_i32 = arith.constant 9 : i32
    %29 = vector.broadcast %c9_i32 : i32 to vector<16x128xi32>
    %30 = arith.shrui %28, %29 : vector<16x128xi32>
    %31 = arith.sitofp %30 : vector<16x128xi32> to vector<16x128xf32>
    %cst = arith.constant 5.000000e-01 : f32
    %32 = vector.broadcast %cst : f32 to vector<16x128xf32>
    %33 = arith.addf %31, %32 : vector<16x128xf32>
    %cst_1 = arith.constant 1.1920929E-7 : f32
    %34 = vector.broadcast %cst_1 : f32 to vector<16x128xf32>
    %35 = arith.mulf %33, %34 : vector<16x128xf32>
    %cst_2 = arith.constant 5.000000e-01 : f32
    %36 = vector.broadcast %cst_2 : f32 to vector<16x128xf32>
    %37 = arith.subf %35, %36 : vector<16x128xf32>
    %38 = arith.mulf %37, %37 : vector<16x128xf32>
    %cst_3 = arith.constant -39.6968307 : f32
    %39 = vector.broadcast %cst_3 : f32 to vector<16x128xf32>
    %40 = arith.mulf %39, %38 : vector<16x128xf32>
    %cst_4 = arith.constant 220.946106 : f32
    %41 = vector.broadcast %cst_4 : f32 to vector<16x128xf32>
    %42 = arith.addf %40, %41 : vector<16x128xf32>
    %43 = arith.mulf %42, %38 : vector<16x128xf32>
    %cst_5 = arith.constant -275.928497 : f32
    %44 = vector.broadcast %cst_5 : f32 to vector<16x128xf32>
    %45 = arith.addf %43, %44 : vector<16x128xf32>
    %46 = arith.mulf %45, %38 : vector<16x128xf32>
    %cst_6 = arith.constant 138.357758 : f32
    %47 = vector.broadcast %cst_6 : f32 to vector<16x128xf32>
    %48 = arith.addf %46, %47 : vector<16x128xf32>
    %49 = arith.mulf %48, %38 : vector<16x128xf32>
    %cst_7 = arith.constant -30.6647987 : f32
    %50 = vector.broadcast %cst_7 : f32 to vector<16x128xf32>
    %51 = arith.addf %49, %50 : vector<16x128xf32>
    %52 = arith.mulf %51, %38 : vector<16x128xf32>
    %cst_8 = arith.constant 2.50662827 : f32
    %53 = vector.broadcast %cst_8 : f32 to vector<16x128xf32>
    %54 = arith.addf %52, %53 : vector<16x128xf32>
    %55 = arith.mulf %54, %37 : vector<16x128xf32>
    %cst_9 = arith.constant -54.4760971 : f32
    %56 = vector.broadcast %cst_9 : f32 to vector<16x128xf32>
    %57 = arith.mulf %56, %38 : vector<16x128xf32>
    %cst_10 = arith.constant 161.585831 : f32
    %58 = vector.broadcast %cst_10 : f32 to vector<16x128xf32>
    %59 = arith.addf %57, %58 : vector<16x128xf32>
    %60 = arith.mulf %59, %38 : vector<16x128xf32>
    %cst_11 = arith.constant -155.698975 : f32
    %61 = vector.broadcast %cst_11 : f32 to vector<16x128xf32>
    %62 = arith.addf %60, %61 : vector<16x128xf32>
    %63 = arith.mulf %62, %38 : vector<16x128xf32>
    %cst_12 = arith.constant 66.8013153 : f32
    %64 = vector.broadcast %cst_12 : f32 to vector<16x128xf32>
    %65 = arith.addf %63, %64 : vector<16x128xf32>
    %66 = arith.mulf %65, %38 : vector<16x128xf32>
    %cst_13 = arith.constant -13.2806816 : f32
    %67 = vector.broadcast %cst_13 : f32 to vector<16x128xf32>
    %68 = arith.addf %66, %67 : vector<16x128xf32>
    %69 = arith.mulf %68, %38 : vector<16x128xf32>
    %cst_14 = arith.constant 1.000000e+00 : f32
    %70 = vector.broadcast %cst_14 : f32 to vector<16x128xf32>
    %71 = arith.addf %69, %70 : vector<16x128xf32>
    %72 = arith.divf %55, %71 : vector<16x128xf32>
    %73 = math.log %35 : vector<16x128xf32>
    %cst_15 = arith.constant -2.000000e+00 : f32
    %74 = vector.broadcast %cst_15 : f32 to vector<16x128xf32>
    %75 = arith.mulf %74, %73 : vector<16x128xf32>
    %76 = math.sqrt %75 : vector<16x128xf32>
    %cst_16 = arith.constant -0.0077848942 : f32
    %77 = vector.broadcast %cst_16 : f32 to vector<16x128xf32>
    %78 = arith.mulf %77, %76 : vector<16x128xf32>
    %cst_17 = arith.constant -0.322396457 : f32
    %79 = vector.broadcast %cst_17 : f32 to vector<16x128xf32>
    %80 = arith.addf %78, %79 : vector<16x128xf32>
    %81 = arith.mulf %80, %76 : vector<16x128xf32>
    %cst_18 = arith.constant -2.40075827 : f32
    %82 = vector.broadcast %cst_18 : f32 to vector<16x128xf32>
    %83 = arith.addf %81, %82 : vector<16x128xf32>
    %84 = arith.mulf %83, %76 : vector<16x128xf32>
    %cst_19 = arith.constant -2.54973245 : f32
    %85 = vector.broadcast %cst_19 : f32 to vector<16x128xf32>
    %86 = arith.addf %84, %85 : vector<16x128xf32>
    %87 = arith.mulf %86, %76 : vector<16x128xf32>
    %cst_20 = arith.constant 4.37466431 : f32
    %88 = vector.broadcast %cst_20 : f32 to vector<16x128xf32>
    %89 = arith.addf %87, %88 : vector<16x128xf32>
    %90 = arith.mulf %89, %76 : vector<16x128xf32>
    %cst_21 = arith.constant 2.938164 : f32
    %91 = vector.broadcast %cst_21 : f32 to vector<16x128xf32>
    %92 = arith.addf %90, %91 : vector<16x128xf32>
    %cst_22 = arith.constant 0.00778469583 : f32
    %93 = vector.broadcast %cst_22 : f32 to vector<16x128xf32>
    %94 = arith.mulf %93, %76 : vector<16x128xf32>
    %cst_23 = arith.constant 0.322467119 : f32
    %95 = vector.broadcast %cst_23 : f32 to vector<16x128xf32>
    %96 = arith.addf %94, %95 : vector<16x128xf32>
    %97 = arith.mulf %96, %76 : vector<16x128xf32>
    %cst_24 = arith.constant 2.44513416 : f32
    %98 = vector.broadcast %cst_24 : f32 to vector<16x128xf32>
    %99 = arith.addf %97, %98 : vector<16x128xf32>
    %100 = arith.mulf %99, %76 : vector<16x128xf32>
    %cst_25 = arith.constant 3.7544086 : f32
    %101 = vector.broadcast %cst_25 : f32 to vector<16x128xf32>
    %102 = arith.addf %100, %101 : vector<16x128xf32>
    %103 = arith.mulf %102, %76 : vector<16x128xf32>
    %cst_26 = arith.constant 1.000000e+00 : f32
    %104 = vector.broadcast %cst_26 : f32 to vector<16x128xf32>
    %105 = arith.addf %103, %104 : vector<16x128xf32>
    %106 = arith.divf %92, %105 : vector<16x128xf32>
    %cst_27 = arith.constant 1.000000e+00 : f32
    %107 = vector.broadcast %cst_27 : f32 to vector<16x128xf32>
    %108 = arith.subf %107, %35 : vector<16x128xf32>
    %109 = math.log %108 : vector<16x128xf32>
    %cst_28 = arith.constant -2.000000e+00 : f32
    %110 = vector.broadcast %cst_28 : f32 to vector<16x128xf32>
    %111 = arith.mulf %110, %109 : vector<16x128xf32>
    %112 = math.sqrt %111 : vector<16x128xf32>
    %cst_29 = arith.constant -0.0077848942 : f32
    %113 = vector.broadcast %cst_29 : f32 to vector<16x128xf32>
    %114 = arith.mulf %113, %112 : vector<16x128xf32>
    %cst_30 = arith.constant -0.322396457 : f32
    %115 = vector.broadcast %cst_30 : f32 to vector<16x128xf32>
    %116 = arith.addf %114, %115 : vector<16x128xf32>
    %117 = arith.mulf %116, %112 : vector<16x128xf32>
    %cst_31 = arith.constant -2.40075827 : f32
    %118 = vector.broadcast %cst_31 : f32 to vector<16x128xf32>
    %119 = arith.addf %117, %118 : vector<16x128xf32>
    %120 = arith.mulf %119, %112 : vector<16x128xf32>
    %cst_32 = arith.constant -2.54973245 : f32
    %121 = vector.broadcast %cst_32 : f32 to vector<16x128xf32>
    %122 = arith.addf %120, %121 : vector<16x128xf32>
    %123 = arith.mulf %122, %112 : vector<16x128xf32>
    %cst_33 = arith.constant 4.37466431 : f32
    %124 = vector.broadcast %cst_33 : f32 to vector<16x128xf32>
    %125 = arith.addf %123, %124 : vector<16x128xf32>
    %126 = arith.mulf %125, %112 : vector<16x128xf32>
    %cst_34 = arith.constant 2.938164 : f32
    %127 = vector.broadcast %cst_34 : f32 to vector<16x128xf32>
    %128 = arith.addf %126, %127 : vector<16x128xf32>
    %cst_35 = arith.constant 0.000000e+00 : f32
    %129 = vector.broadcast %cst_35 : f32 to vector<16x128xf32>
    %130 = arith.subf %129, %128 : vector<16x128xf32>
    %cst_36 = arith.constant 0.00778469583 : f32
    %131 = vector.broadcast %cst_36 : f32 to vector<16x128xf32>
    %132 = arith.mulf %131, %112 : vector<16x128xf32>
    %cst_37 = arith.constant 0.322467119 : f32
    %133 = vector.broadcast %cst_37 : f32 to vector<16x128xf32>
    %134 = arith.addf %132, %133 : vector<16x128xf32>
    %135 = arith.mulf %134, %112 : vector<16x128xf32>
    %cst_38 = arith.constant 2.44513416 : f32
    %136 = vector.broadcast %cst_38 : f32 to vector<16x128xf32>
    %137 = arith.addf %135, %136 : vector<16x128xf32>
    %138 = arith.mulf %137, %112 : vector<16x128xf32>
    %cst_39 = arith.constant 3.7544086 : f32
    %139 = vector.broadcast %cst_39 : f32 to vector<16x128xf32>
    %140 = arith.addf %138, %139 : vector<16x128xf32>
    %141 = arith.mulf %140, %112 : vector<16x128xf32>
    %cst_40 = arith.constant 1.000000e+00 : f32
    %142 = vector.broadcast %cst_40 : f32 to vector<16x128xf32>
    %143 = arith.addf %141, %142 : vector<16x128xf32>
    %144 = arith.divf %130, %143 : vector<16x128xf32>
    %cst_41 = arith.constant 2.425000e-02 : f32
    %145 = vector.broadcast %cst_41 : f32 to vector<16x128xf32>
    %146 = arith.cmpf olt, %35, %145 : vector<16x128xf32>
    %cst_42 = arith.constant 9.757500e-01 : f32
    %147 = vector.broadcast %cst_42 : f32 to vector<16x128xf32>
    %148 = arith.cmpf ogt, %35, %147 : vector<16x128xf32>
    %149 = arith.select %148, %144, %72 : vector<16x128xi1>, vector<16x128xf32>
    %150 = arith.select %146, %106, %149 : vector<16x128xi1>, vector<16x128xf32>
    %c0_43 = arith.constant 0 : index
    %c0_44 = arith.constant 0 : index
    %151 = vector.load %arg2[%c0_43, %c0_44] : memref<16x128xf32, #tpu.memory_space<vmem>>, vector<16x128xf32>
    %cst_45 = arith.constant 1.000000e-01 : f32
    %152 = vector.broadcast %cst_45 : f32 to vector<16x128xf32>
    %153 = arith.mulf %152, %150 : vector<16x128xf32>
    %cst_46 = arith.constant 1.000000e+00 : f32
    %154 = vector.broadcast %cst_46 : f32 to vector<16x128xf32>
    %155 = arith.addf %154, %153 : vector<16x128xf32>
    %156 = arith.mulf %151, %155 : vector<16x128xf32>
    %c0_47 = arith.constant 0 : index
    %c0_48 = arith.constant 0 : index
    %157 = vector.load %arg3[%c0_47, %c0_48] : memref<16x128xf32, #tpu.memory_space<vmem>>, vector<16x128xf32>
    tpu.vector_store %arg3[%c0_47, %c0_48], %156 {strides = array<i32>} : memref<16x128xf32, #tpu.memory_space<vmem>>, vector<16x128xf32>,
    return
  }
  func.func @transform_0(%arg0: i32, %arg1: memref<1xi32, #tpu.memory_space<smem>>) -> (i32, i32) {
    %c0_i32 = arith.constant 0 : i32
    %c0_i32_0 = arith.constant 0 : i32
    return %arg0, %c0_i32 : i32, i32
  }
  func.func @transform_1(%arg0: i32, %arg1: memref<1xi32, #tpu.memory_space<smem>>) -> (i32, i32) {
    %c0_i32 = arith.constant 0 : i32
    %c0_i32_0 = arith.constant 0 : i32
    return %arg0, %c0_i32 : i32, i32
  }
}

</mosaic_0001>

<bundles_post_ra>
// kernel: gaussian_noise.1
= control target key start
LH: loop header
LB: loop body
LE: loop exit
PB: predicated region body
PF: predicated region fallthrough
CT: control target
= control target key end

     0   :  { %v10_v0 = vlaneseq  ;;  %s394_s0 = inlined_call_operand.<no memory space> [shape: s32[1], index: 0, kind: input, shape index: {}]   ;;  %s395_s1 = inlined_call_operand.vmem [shape: f32[16,128], index: 1, kind: input, shape index: {}]   ;;  %s396_s2 = inlined_call_operand.vmem [shape: f32[16,128], index: 2, kind: output, shape index: {}]  }
   0x1   :  { %s24_s11 = smul.u32 374761393, %s394_s0 }
   0x2   :  { %v11_v1 = vshrl.u32 %v10_v0, 7  ;;  %v14_v2 = vand.u32 127, %v10_v0 }
   0x3   :  { %v25_v5 = vstv %s24_s11 }
   0x4   :  { %v12_v3 = vadd.s32 8, %v11_v1  ;;  %v16_v4 = vmul.u32 128, %v11_v1 }
   0x6   :  { %v17_v6 = vmul.u32 128, %v12_v3  ;;  %v21_v7 = vadd.s32 %v16_v4, %v14_v2 }
   0x8   :  { %v22_v8 = vadd.s32 %v17_v6, %v14_v2  ;;  %v26_v9 = vadd.s32 %v25_v5, %v21_v7 }
   0xa   :  { %v27_v10 = vadd.s32 %v25_v5, %v22_v8  ;;  %v28_v11 = vmul.u32 2654435769, %v26_v9 }
   0xc   :  { %v29_v12 = vmul.u32 2654435769, %v27_v10  ;;  %v30_v13 = vadd.s32 1, %v28_v11 }
   0xe   :  { %v31_v14 = vadd.s32 1, %v29_v12  ;;  %v32_v15 = vshrl.u32 %v30_v13, 16 }
  0x10   :  { %v33_v16 = vshrl.u32 %v31_v14, 16  ;;  %v34_v17 = vxor.u32 %v32_v15, %v30_v13 }
  0x12   :  { %v35_v18 = vxor.u32 %v33_v16, %v31_v14  ;;  %v36_v19 = vmul.u32 2146121005, %v34_v17 }
  0x14   :  { %v37_v20 = vmul.u32 2146121005, %v35_v18  ;;  %v38_v21 = vshrl.u32 %v36_v19, 15 }
  0x16   :  { %v39_v22 = vshrl.u32 %v37_v20, 15  ;;  %v40_v23 = vxor.u32 %v38_v21, %v36_v19 }
  0x18   :  { %v41_v24 = vxor.u32 %v39_v22, %v37_v20  ;;  %v42_v25 = vmul.u32 2221713035, %v40_v23 }
  0x1a   :  { %v43_v26 = vmul.u32 2221713035, %v41_v24  ;;  %v44_v27 = vshrl.u32 %v42_v25, 16 }
  0x1c   :  { %v45_v28 = vshrl.u32 %v43_v26, 16  ;;  %v46_v29 = vxor.u32 %v44_v27, %v42_v25 }
  0x1e   :  { %v47_v30 = vxor.u32 %v45_v28, %v43_v26  ;;  %v48_v31 = vshrl.u32 %v46_v29, 9 }
  0x20   :  { %v49_v32 = vshrl.u32 %v47_v30, 9  ;;  %v50_v33 = vcvt.s32.f32 %v48_v31 }
  0x22   :  { %v51_v34 = vcvt.s32.f32 %v49_v32  ;;  %v52_v35 = vadd.f32 0.5, %v50_v33 }
  0x24   :  { %v53_v36 = vadd.f32 0.5, %v51_v34  ;;  %v300_v37 = vmul.f32 1.1920929e-07, %v52_v35 }
  0x26   :  { %v302_v38 = vmul.f32 1.1920929e-07, %v53_v36  ;;  %v305_v39 = vadd.f32 -0.5, %v300_v37  ;;  %254 = vlog2.f32 %v300_v37  ;;  %v166_v40 = vsub.f32 1.0, %v300_v37 }
  0x27   :  { %vm232_vm8 = vcmp.gt.f32.partialorder %v300_v37, 0.97575  ;;  %vm230_vm9 = vcmp.lt.f32.partialorder %v300_v37, 0.02425 }
  0x28   :  { %v310_v41 = vadd.f32 -0.5, %v302_v38  ;;  %v314_v42 = vmul.f32 %v305_v39, %v305_v39  ;;  %256 = vlog2.f32 %v302_v38  ;;  %v167_v43 = vsub.f32 1.0, %v302_v38 }
  0x29   :  { %258 = vlog2.f32 %v166_v40  ;;  %vm233_vm10 = vcmp.gt.f32.partialorder %v302_v38, 0.97575  ;;  %vm231_vm11 = vcmp.lt.f32.partialorder %v302_v38, 0.02425 }
  0x2a   :  { %v320_v44 = vmul.f32 %v310_v41, %v310_v41  ;;  %v82_v45 = vmul.f32 -54.476097, %v314_v42  ;;  %260 = vlog2.f32 %v167_v43  ;;  %v60_v47 = vmul.f32 -39.69683, %v314_v42 }
  0x2c   :  { %v83_v46 = vmul.f32 -54.476097, %v320_v44  ;;  %v61_v48 = vmul.f32 -39.69683, %v320_v44  ;;  %v84_v50 = vadd.f32 161.58583, %v82_v45 }
  0x2d   :  { %v62_v54 = vadd.f32 220.9461, %v60_v47 }
  0x2e   :  { %v85_v51 = vadd.f32 161.58583, %v83_v46  ;;  %v63_v56 = vadd.f32 220.9461, %v61_v48  ;;  %v86_v59 = vmul.f32 %v84_v50, %v314_v42 }
  0x2f   :  { %v64_v0 = vmul.f32 %v62_v54, %v314_v42 }
  0x30   :  { %v255_v49 = vpop.eup %254  ;;  %v87_v60 = vmul.f32 %v85_v51, %v320_v44  ;;  %v65_v1 = vmul.f32 %v63_v56, %v320_v44  ;;  %v88_v2 = vadd.f32 -155.69897, %v86_v59 }
  0x31   :  { %v107_v52 = vmul.f32 0.6931472, %v255_v49  ;;  %v66_v6 = vadd.f32 -275.9285, %v64_v0 }
  0x32   :  { %v257_v53 = vpop.eup %256  ;;  %v89_v3 = vadd.f32 -155.69897, %v87_v60  ;;  %v67_v7 = vadd.f32 -275.9285, %v65_v1  ;;  %v90_v9 = vmul.f32 %v88_v2, %v314_v42 }
  0x33   :  { %v259_v55 = vpop.eup %258  ;;  %v109_v57 = vmul.f32 0.6931472, %v257_v53  ;;  %v110_v58 = vmul.f32 -2.0, %v107_v52  ;;  %v68_v12 = vmul.f32 %v66_v6, %v314_v42 }
  0x34   :  { %v169_v62 = vmul.f32 0.6931472, %v259_v55  ;;  %v261_v63 = vpop.eup %260  ;;  %v91_v10 = vmul.f32 %v89_v3, %v320_v44  ;;  %v69_v13 = vmul.f32 %v67_v7, %v320_v44  ;;  %v92_v15 = vadd.f32 66.801315, %v90_v9 }
  0x35   :  { %v111_v61 = vmul.f32 -2.0, %v109_v57  ;;  %262 = vrsqrt.f32 %v110_v58  ;;  %v171_v4 = vmul.f32 0.6931472, %v261_v63  ;;  %vm114_vm0 = vcmp.eq.f32.partialorder %v110_v58, inf }
  0x36   :  { %v172_v5 = vmul.f32 -2.0, %v169_v62  ;;  %v117_v14 = vand.u32 2147483648, %v110_v58  ;;  %vm116_vm1 = vcmp.eq.f32.partialorder %v110_v58, 0.0  ;;  %v93_v18 = vadd.f32 66.801315, %v91_v10 }
  0x37   :  { %264 = vrsqrt.f32 %v111_v61  ;;  %v173_v8 = vmul.f32 -2.0, %v171_v4  ;;  %vm121_vm2 = vcmp.eq.f32.partialorder %v111_v61, inf  ;;  %v124_v19 = vand.u32 2147483648, %v111_v61 }
  0x38   :  { %266 = vrsqrt.f32 %v172_v5  ;;  %vm123_vm3 = vcmp.eq.f32.partialorder %v111_v61, 0.0  ;;  %v70_v22 = vadd.f32 138.35776, %v68_v12  ;;  %v71_v23 = vadd.f32 138.35776, %v69_v13 }
  0x39   :  { %268 = vrsqrt.f32 %v173_v8  ;;  %v94_v25 = vmul.f32 %v92_v15, %v314_v42  ;;  %v95_v30 = vmul.f32 %v93_v18, %v320_v44  ;;  %vm176_vm4 = vcmp.eq.f32.partialorder %v172_v5, inf }
  0x3a   :  { %v179_v32 = vand.u32 2147483648, %v172_v5  ;;  %vm178_vm5 = vcmp.eq.f32.partialorder %v172_v5, 0.0  ;;  %vm183_vm6 = vcmp.eq.f32.partialorder %v173_v8, inf  ;;  %v186_v45 = vand.u32 2147483648, %v173_v8 }
  0x3b   :  { %v72_v50 = vmul.f32 %v70_v22, %v314_v42  ;;  %vm185_vm7 = vcmp.eq.f32.partialorder %v173_v8, 0.0  ;;  %v96_v57 = vadd.f32 -13.280682, %v94_v25 }
  0x3d   :  { %v98_v13 = vmul.f32 %v96_v57, %v314_v42 }
  0x3f   :  { %v263_v11 = vpop.eup %262 }
  0x40   :  { %v113_v16 = vmul.f32 %v263_v11, %v110_v58 }
  0x41   :  { %v265_v17 = vpop.eup %264 }
  0x42   :  { %v115_v20 = vsel %vm114_vm0, %v110_v58, %v113_v16  ;;  %v120_v21 = vmul.f32 %v265_v17, %v111_v61  ;;  %v267_v29 = vpop.eup %266 }
  0x43   :  { %v334_v24 = vsel %vm116_vm1, %v117_v14, %v115_v20  ;;  %v175_v36 = vmul.f32 %v267_v29, %v172_v5  ;;  %v269_v40 = vpop.eup %268 }
  0x44   :  { %v122_v26 = vsel %vm121_vm2, %v111_v61, %v120_v21  ;;  %v126_v27 = vmul.f32 -0.007784894, %v334_v24  ;;  %v146_v28 = vmul.f32 0.007784696, %v334_v24  ;;  %v182_v52 = vmul.f32 %v269_v40, %v173_v8 }
  0x45   :  { %v340_v31 = vsel %vm123_vm3, %v124_v19, %v122_v26  ;;  %v177_v49 = vsel %vm176_vm4, %v172_v5, %v175_v36  ;;  %v97_v61 = vadd.f32 -13.280682, %v95_v30  ;;  %v73_v5 = vmul.f32 %v71_v23, %v320_v44 }
  0x46   :  { %v127_v33 = vmul.f32 -0.007784894, %v340_v31  ;;  %v128_v34 = vadd.f32 -0.32239646, %v126_v27  ;;  %v147_v35 = vmul.f32 0.007784696, %v340_v31  ;;  %v349_v56 = vsel %vm178_vm5, %v179_v32, %v177_v49 }
  0x47   :  { %v148_v43 = vadd.f32 0.32246712, %v146_v28  ;;  %v184_v59 = vsel %vm183_vm6, %v173_v8, %v182_v52  ;;  %v188_v60 = vmul.f32 -0.007784894, %v349_v56  ;;  %v210_v4 = vmul.f32 0.007784696, %v349_v56 }
  0x48   :  { %v129_v46 = vadd.f32 -0.32239646, %v127_v33  ;;  %v130_v47 = vmul.f32 %v128_v34, %v334_v24  ;;  %v149_v48 = vadd.f32 0.32246712, %v147_v35  ;;  %v187_v0 = vsel %vm185_vm7, %v186_v45, %v184_v59 }
  0x49   :  { %v150_v51 = vmul.f32 %v148_v43, %v334_v24  ;;  %v189_v2 = vmul.f32 -0.007784894, %v187_v0  ;;  %v190_v3 = vadd.f32 -0.32239646, %v188_v60  ;;  %v211_v9 = vmul.f32 0.007784696, %v187_v0 }
  0x4a   :  { %v131_v53 = vmul.f32 %v129_v46, %v340_v31  ;;  %v132_v54 = vadd.f32 -2.4007583, %v130_v47  ;;  %v151_v55 = vmul.f32 %v149_v48, %v340_v31  ;;  %v212_v12 = vadd.f32 0.32246712, %v210_v4 }
  0x4b   :  { %v152_v58 = vadd.f32 2.4451342, %v150_v51  ;;  %v191_v10 = vadd.f32 -0.32239646, %v189_v2  ;;  %v192_v11 = vmul.f32 %v190_v3, %v349_v56  ;;  %v213_v16 = vadd.f32 0.32246712, %v211_v9 }
  0x4c   :  { %v133_v62 = vadd.f32 -2.4007583, %v131_v53  ;;  %v153_v63 = vadd.f32 2.4451342, %v151_v55  ;;  %v134_v6 = vmul.f32 %v132_v54, %v334_v24  ;;  %v99_v17 = vmul.f32 %v97_v61, %v320_v44 }
  0x4d   :  { %v154_v1 = vmul.f32 %v152_v58, %v334_v24  ;;  %v193_v18 = vmul.f32 %v191_v10, %v187_v0  ;;  %v194_v19 = vadd.f32 -2.4007583, %v192_v11  ;;  %v214_v20 = vmul.f32 %v212_v12, %v349_v56 }
  0x4e   :  { %v155_v7 = vmul.f32 %v153_v63, %v340_v31  ;;  %v135_v14 = vmul.f32 %v133_v62, %v340_v31  ;;  %v74_v21 = vadd.f32 -30.664799, %v72_v50  ;;  %v136_v22 = vadd.f32 -2.5497324, %v134_v6 }
  0x4f   :  { %v156_v8 = vadd.f32 3.7544086, %v154_v1  ;;  %v215_v25 = vmul.f32 %v213_v16, %v187_v0  ;;  %v195_v27 = vadd.f32 -2.4007583, %v193_v18  ;;  %v196_v28 = vmul.f32 %v194_v19, %v349_v56 }
  0x50   :  { %v157_v15 = vadd.f32 3.7544086, %v155_v7  ;;  %v216_v29 = vadd.f32 2.4451342, %v214_v20  ;;  %v100_v30 = vadd.f32 1.0, %v98_v13  ;;  %v101_v34 = vadd.f32 1.0, %v99_v17 }
  0x51   :  { %v158_v23 = vmul.f32 %v156_v8, %v334_v24  ;;  %v137_v32 = vadd.f32 -2.5497324, %v135_v14  ;;  %v217_v33 = vadd.f32 2.4451342, %v215_v25  ;;  %v197_v35 = vmul.f32 %v195_v27, %v187_v0  ;;  %v238_v27 = vld [vmem:[%s395_s1] sm:$0xff] }
  0x52   :  { %v159_v26 = vmul.f32 %v157_v15, %v340_v31  ;;  %v198_v36 = vadd.f32 -2.5497324, %v196_v28  ;;  %v218_v40 = vmul.f32 %v216_v29, %v349_v56  ;;  %v75_v43 = vadd.f32 -30.664799, %v73_v5  ;;  %v239_v29 = vld [vmem:[%s395_s1 + $0x8] sm:$0xff] }
  0x53   :  { %v138_v45 = vmul.f32 %v136_v22, %v334_v24  ;;  %v160_v46 = vadd.f32 1.0, %v158_v23  ;;  %v219_v47 = vmul.f32 %v217_v33, %v187_v0  ;;  %v199_v49 = vadd.f32 -2.5497324, %v197_v35 }
  0x54   :  { %v161_v48 = vadd.f32 1.0, %v159_v26  ;;  %v200_v50 = vmul.f32 %v198_v36, %v349_v56  ;;  %v220_v51 = vadd.f32 3.7544086, %v218_v40  ;;  %270 = vrcp.f32 %v100_v30 }
  0x55   :  { %v139_v52 = vmul.f32 %v137_v32, %v340_v31  ;;  %v221_v53 = vadd.f32 3.7544086, %v219_v47  ;;  %272 = vrcp.f32 %v101_v34  ;;  %v201_v54 = vmul.f32 %v199_v49, %v187_v0 }
  0x56   :  { %v202_v55 = vadd.f32 4.3746643, %v200_v50  ;;  %v222_v57 = vmul.f32 %v220_v51, %v349_v56  ;;  %v76_v58 = vmul.f32 %v74_v21, %v314_v42  ;;  %v77_v59 = vmul.f32 %v75_v43, %v320_v44 }
  0x57   :  { %274 = vrcp.f32 %v160_v46  ;;  %v223_v60 = vmul.f32 %v221_v53, %v187_v0  ;;  %v140_v61 = vadd.f32 4.3746643, %v138_v45  ;;  %v203_v62 = vadd.f32 4.3746643, %v201_v54 }
  0x58   :  { %276 = vrcp.f32 %v161_v48  ;;  %v224_v63 = vadd.f32 1.0, %v222_v57  ;;  %v141_v1 = vadd.f32 4.3746643, %v139_v52  ;;  %v204_v2 = vmul.f32 %v202_v55, %v349_v56 }
  0x59   :  { %v225_v3 = vadd.f32 1.0, %v223_v60  ;;  %v205_v4 = vmul.f32 %v203_v62, %v187_v0  ;;  %v78_v5 = vadd.f32 2.5066283, %v76_v58  ;;  %v79_v6 = vadd.f32 2.5066283, %v77_v59 }
  0x5a   :  { %278 = vrcp.f32 %v224_v63  ;;  %v142_v7 = vmul.f32 %v140_v61, %v334_v24  ;;  %v143_v42 = vmul.f32 %v141_v1, %v340_v31  ;;  %v206_v44 = vadd.f32 2.938164, %v204_v2 }
  0x5b   :  { %280 = vrcp.f32 %v225_v3  ;;  %v207_v9 = vadd.f32 2.938164, %v205_v4  ;;  %v80_v10 = vmul.f32 %v305_v39, %v78_v5  ;;  %v81_v12 = vmul.f32 %v310_v41, %v79_v6 }
  0x5c   :  { %v144_v13 = vadd.f32 2.938164, %v142_v7  ;;  %v145_v14 = vadd.f32 2.938164, %v143_v42  ;;  %v208_v0 = vsub.f32 0.0, %v206_v44 }
  0x5d   :  { %v209_v16 = vsub.f32 0.0, %v207_v9 }
  0x5e   :  { %v271_v8 = vpop.eup %270 }
  0x5f   :  { %v273_v11 = vpop.eup %272  ;;  %v103_v17 = vmul.f32 %v271_v8, %v80_v10 }
  0x60   :  { %v105_v19 = vmul.f32 %v273_v11, %v81_v12 }
  0x61   :  { %v275_v56 = vpop.eup %274 }
  0x62   :  { %v277_v15 = vpop.eup %276  ;;  %v163_v24 = vmul.f32 %v275_v56, %v144_v13 }
  0x63   :  { %v165_v20 = vmul.f32 %v277_v15, %v145_v14 }
  0x64   :  { %v279_v18 = vpop.eup %278 }
  0x65   :  { %v281_v31 = vpop.eup %280  ;;  %v227_v21 = vmul.f32 %v279_v18, %v208_v0 }
  0x66   :  { %v229_v39 = vmul.f32 %v281_v31, %v209_v16 }
  0x67   :  { %v234_v41 = vsel %vm232_vm8, %v227_v21, %v103_v17 }
  0x68   :  { %v235_v22 = vsel %vm233_vm10, %v229_v39, %v105_v19  ;;  %v236_v23 = vsel %vm230_vm9, %v163_v24, %v234_v41 }
  0x69   :  { %v237_v25 = vsel %vm231_vm11, %v165_v20, %v235_v22  ;;  %v240_v26 = vmul.f32 0.1, %v236_v23 }
  0x6a   :  { %v241_v28 = vmul.f32 0.1, %v237_v25 }
  0x6b   :  { %v242_v37 = vadd.f32 1.0, %v240_v26 }
  0x6c   :  { %v243_v30 = vadd.f32 1.0, %v241_v28 }
  0x6d   :  { %v244_v32 = vmul.f32 %v242_v37, %v238_v27 }
  0x6e   :  { %v245_v33 = vmul.f32 %v243_v30, %v239_v29 }
  0x6f   :  { %246 = vst [vmem:[%s396_s2] sm:$0xff] %v244_v32 }
  0x70   :  { %247 = vst [vmem:[%s396_s2 + $0x8] sm:$0xff] %v245_v33 }

</bundles_post_ra>
